<compile_context>
chip_gen: v7x
topology: tpu7x:2x2x1
jax: 0.10.0
libtpu: 0.0.40
codegen_flags: <defaults>
</compile_context>

<pallas_src>
import jax
import jax.numpy as jnp
from jax import lax
from jax.experimental import pallas as pl
from jax.experimental.pallas import tpu as pltpu

N_HEADS = 4
LN_EPS = 1e-5  # PyTorch LayerNorm default


def _matmul_bf16(x_f32, w_bf16):
    # x: (M, K) f32, w: (K, N) bf16 (already (in, out) layout).
    # bf16 operands on the MXU, f32 accumulation.
    return lax.dot_general(
        x_f32.astype(jnp.bfloat16), w_bf16,
        (((1,), (0,)), ((), ())),
        preferred_element_type=jnp.float32,
    )


def _layernorm(x, gamma2d, beta2d):
    mu = jnp.mean(x, axis=-1, keepdims=True)
    xc = x - mu
    var = jnp.mean(xc * xc, axis=-1, keepdims=True)
    inv = lax.rsqrt(var + LN_EPS)
    return xc * inv * gamma2d + beta2d


def transformer_block_kernel(
    x_ref,       # (Bt, S, E) f32 activations (pipelined over the batch grid)
    wqkv_ref,    # (E, 3E)  bf16, (in, out); Q columns pre-scaled by 1/sqrt(Dh)
    bqkv_ref,    # (1, 3E)  f32;  Q part pre-scaled
    wo_ref,      # (E, E)   bf16, (in, out)   attention out-proj
    bo_ref,      # (1, E)   f32
    g1_ref,      # (1, E)   f32  ln1 gamma
    b1_ref,      # (1, E)   f32  ln1 beta
    wf1_ref,     # (E, 4E)  bf16 ff first linear
    bf1_ref,     # (1, 4E)  f32
    wf2_ref,     # (4E, E)  bf16 ff second linear
    bf2_ref,     # (1, E)   f32
    g2_ref,      # (1, E)   f32  ln2 gamma
    b2_ref,      # (1, E)   f32  ln2 beta
    o_ref,       # (Bt, S, E)
):
    Bt, S, E = x_ref.shape
    H = N_HEADS
    Dh = E // H

    x = x_ref[...].astype(jnp.float32)          # (Bt, S, E)
    x2 = x.reshape(Bt * S, E)                   # token-major rows for the MXU

    # ---- fused QKV projection (bf16 MXU, f32 accumulation) ----
    qkv = _matmul_bf16(x2, wqkv_ref[...]) + bqkv_ref[...]      # (Bt*S, 3E) f32

    # ---- head-batched multi-head self-attention ----
    # (Bt*S, E) -> (Bt, S, H, Dh) -> (Bt, H, S, Dh) -> (Bt*H, S, Dh)
    def to_heads(t2d):
        t = t2d.reshape(Bt, S, H, Dh)
        t = jnp.swapaxes(t, 1, 2)
        return t.reshape(Bt * H, S, Dh).astype(jnp.bfloat16)

    q = to_heads(qkv[:, 0 * E:1 * E])   # already carries 1/sqrt(Dh) scale
    k = to_heads(qkv[:, 1 * E:2 * E])
    v = to_heads(qkv[:, 2 * E:3 * E])

    # One batched MXU dispatch over Bt*H heads.
    s = jnp.einsum("bqd,bkd->bqk", q, k,
                   preferred_element_type=jnp.float32)         # (Bt*H, S, S) f32
    m = jnp.max(s, axis=-1, keepdims=True)
    p = jnp.exp(s - m)                                         # unnormalized probs
    denom = jnp.sum(p, axis=-1, keepdims=True)                 # (Bt*H, S, 1)
    ctx = jnp.einsum("bqk,bkd->bqd", p.astype(jnp.bfloat16), v,
                     preferred_element_type=jnp.float32)       # (Bt*H, S, Dh) f32
    # Normalize AFTER the PV matmul (S*Dh mults instead of S*S).
    ctx = ctx * pl.reciprocal(denom, approx=True)

    # (Bt*H, S, Dh) -> (Bt, H, S, Dh) -> (Bt, S, H, Dh) -> (Bt*S, E)
    ctx = jnp.swapaxes(ctx.reshape(Bt, H, S, Dh), 1, 2).reshape(Bt * S, E)
    attn = _matmul_bf16(ctx, wo_ref[...]) + bo_ref[...]        # out projection

    # ---- residual + LN1 (f32 on the VPU) ----
    y = _layernorm(x2 + attn, g1_ref[...], b1_ref[...])        # (Bt*S, E)

    # ---- feed-forward (bf16 MXU, f32 accumulation) ----
    h1 = _matmul_bf16(y, wf1_ref[...]) + bf1_ref[...]          # (Bt*S, 4E)
    h1 = jnp.maximum(h1, 0.0)                                  # ReLU
    ff = _matmul_bf16(h1, wf2_ref[...]) + bf2_ref[...]         # (Bt*S, E)

    # ---- residual + LN2 ----
    out = _layernorm(y + ff, g2_ref[...], b2_ref[...])
    o_ref[...] = out.reshape(Bt, S, E).astype(o_ref.dtype)


def _pick_batch_tile(B, S, max_rows=512):
    """Largest divisor Bt of B with Bt*S token rows <= max_rows AND at least
    2 grid steps when B >= 2 (so the 'parallel' axis can use both v7x TCs)."""
    best = 1
    for cand in range(1, B + 1):
        if B % cand:
            continue
        if cand * S > max(max_rows, S):
            continue
        if B >= 2 and (B // cand) < 2:
            continue
        best = cand
    return best


def _vmem_limit_bytes():
    """Generation-aware VMEM budget: 75% of physical, capped at ~110 MiB."""
    try:
        phys = pltpu.get_tpu_info().vmem_capacity_bytes
    except Exception:
        phys = 64 * 1024 * 1024  # conservative (v7x per-TC)
    return int(min(phys * 3 // 4, 110 * 1024 * 1024))


def prepare_params(p, n_embd):
    """PyTorch-layout f32 params -> kernel layout:
       * Linear weights transposed to (in, out) and cast to bf16.
       * 1/sqrt(head_dim) folded into the Q part of the in-proj weight/bias."""
    E = n_embd
    Dh = E // N_HEADS
    scale = 1.0 / float(Dh) ** 0.5

    wqkv_t = jnp.transpose(p["wqkv"])                    # (E, 3E)
    wqkv_t = wqkv_t.at[:, :E].multiply(scale)
    bqkv = p["bqkv"].at[:, :E].multiply(scale)           # (1, 3E)

    return {
        "wqkv": wqkv_t.astype(jnp.bfloat16),
        "bqkv": bqkv.astype(jnp.float32),
        "wo": jnp.transpose(p["wo"]).astype(jnp.bfloat16),    # (E, E)
        "bo": p["bo"].astype(jnp.float32),
        "ln1_g": p["ln1_g"].astype(jnp.float32),
        "ln1_b": p["ln1_b"].astype(jnp.float32),
        "wf1": jnp.transpose(p["wf1"]).astype(jnp.bfloat16),  # (E, 4E)
        "bf1": p["bf1"].astype(jnp.float32),
        "wf2": jnp.transpose(p["wf2"]).astype(jnp.bfloat16),  # (4E, E)
        "bf2": p["bf2"].astype(jnp.float32),
        "ln2_g": p["ln2_g"].astype(jnp.float32),
        "ln2_b": p["ln2_b"].astype(jnp.float32),
    }


def transformer_block(x, params, *, batch_tile=None):
    """x: (B, S, E) float32. params: PyTorch-layout weights (see init_params)."""
    B, S, E = x.shape
    assert E % N_HEADS == 0, "n_embd must be divisible by n_heads"
    Bt = batch_tile if batch_tile is not None else _pick_batch_tile(B, S)
    assert B % Bt == 0

    kp = prepare_params(params, E)

    # Weights / biases / LN params: whole-array VMEM residents, single-buffered
    # (constant across the grid -> no point double-buffering them).
    vmem_resident = pl.BlockSpec(memory_space=pltpu.MemorySpace.VMEM)

    kernel = pl.pallas_call(
        transformer_block_kernel,
        out_shape=jax.ShapeDtypeStruct((B, S, E), x.dtype),
        grid=(B // Bt,),
        in_specs=[
            pl.BlockSpec((Bt, S, E), lambda b: (b, 0, 0)),   # x (pipelined)
            vmem_resident,   # wqkv
            vmem_resident,   # bqkv
            vmem_resident,   # wo
            vmem_resident,   # bo
            vmem_resident,   # ln1 gamma
            vmem_resident,   # ln1 beta
            vmem_resident,   # wf1
            vmem_resident,   # bf1
            vmem_resident,   # wf2
            vmem_resident,   # bf2
            vmem_resident,   # ln2 gamma
            vmem_resident,   # ln2 beta
        ],
        out_specs=pl.BlockSpec((Bt, S, E), lambda b: (b, 0, 0)),
        compiler_params=pltpu.CompilerParams(
            dimension_semantics=("parallel",),
            vmem_limit_bytes=_vmem_limit_bytes(),
        ),
    )
    return kernel(
        x,
        kp["wqkv"], kp["bqkv"], kp["wo"], kp["bo"],
        kp["ln1_g"], kp["ln1_b"],
        kp["wf1"], kp["bf1"], kp["wf2"], kp["bf2"],
        kp["ln2_g"], kp["ln2_b"],
    )


def init_params(key, n_embd):
    """Deterministic synthetic parameters with the same shapes as the
    PyTorch module (MHA packed in-proj, out-proj, two LayerNorms, MLP)."""
    E = n_embd
    ks = jax.random.split(key, 8)
    s = 0.05
    return {
        # nn.MultiheadAttention: in_proj_weight (3E, E), in_proj_bias as (1, 3E)
        "wqkv": s * jax.random.normal(ks[0], (3 * E, E), jnp.float32),
        "bqkv": s * jax.random.normal(ks[1], (1, 3 * E), jnp.float32),
        # out_proj: (E, E), (E,)
        "wo": s * jax.random.normal(ks[2], (E, E), jnp.float32),
        "bo": s * jax.random.normal(ks[3], (1, E), jnp.float32),
        # LayerNorm 1 (PyTorch default init: ones / zeros)
        "ln1_g": jnp.ones((1, E), jnp.float32),
        "ln1_b": jnp.zeros((1, E), jnp.float32),
        # ff: Linear(E, 4E), Linear(4E, E)  (weights stored (out, in))
        "wf1": s * jax.random.normal(ks[4], (4 * E, E), jnp.float32),
        "bf1": s * jax.random.normal(ks[5], (1, 4 * E), jnp.float32),
        "wf2": s * jax.random.normal(ks[6], (E, 4 * E), jnp.float32),
        "bf2": s * jax.random.normal(ks[7], (1, E), jnp.float32),
        # LayerNorm 2
        "ln2_g": jnp.ones((1, E), jnp.float32),
        "ln2_b": jnp.zeros((1, E), jnp.float32),
    }


def reference_block(x, p):
    """Pure-JAX f32 reference (same math) for a sanity check."""
    E = x.shape[-1]
    H = N_HEADS
    Dh = E // H
    qkv = jnp.einsum("bse,fe->bsf", x, p["wqkv"]) + p["bqkv"][0]
    q, k, v = jnp.split(qkv, 3, axis=-1)

    def heads(t):  # (B,S,E) -> (B,H,S,Dh)
        B, S, _ = t.shape
        return t.reshape(B, S, H, Dh).transpose(0, 2, 1, 3)

    qh, kh, vh = heads(q), heads(k), heads(v)
    scores = jnp.einsum("bhqd,bhkd->bhqk", qh, kh) / (Dh ** 0.5)
    w = jax.nn.softmax(scores, axis=-1)
    o = jnp.einsum("bhqk,bhkd->bhqd", w, vh)
    B, S = x.shape[0], x.shape[1]
    o = o.transpose(0, 2, 1, 3).reshape(B, S, E)
    attn = jnp.einsum("bse,fe->bsf", o, p["wo"]) + p["bo"][0]

    def ln(t, g, b):
        mu = t.mean(-1, keepdims=True)
        var = ((t - mu) ** 2).mean(-1, keepdims=True)
        return (t - mu) * lax.rsqrt(var + LN_EPS) * g[0] + b[0]

    y = ln(x + attn, p["ln1_g"], p["ln1_b"])
    h1 = jax.nn.relu(jnp.einsum("bse,fe->bsf", y, p["wf1"]) + p["bf1"][0])
    ff = jnp.einsum("bsf,ef->bse", h1, p["wf2"]) + p["bf2"][0]
    return ln(y + ff, p["ln2_g"], p["ln2_b"])


if __name__ == "__main__":
    B, S, E = 2, 8, 32  # batch=2, seq=8, n_embd=32, n_heads=4 -> head_dim=8
    key = jax.random.PRNGKey(0)
    kx, kp = jax.random.split(key)
    x = jax.random.normal(kx, (B, S, E), jnp.float32)
    params = init_params(kp, E)

    out = transformer_block(x, params)
    out = jax.block_until_ready(out)

    ref = reference_block(x, params)
    assert out.shape == (B, S, E)
    # Kernel uses bf16 MXU matmuls (f32 accumulation) + approx reciprocal, so
    # the tolerance vs. the pure-f32 reference is looser than exact f32.
    err = float(jnp.max(jnp.abs(out - ref)))
    assert err < 5e-2, f"max abs error vs reference: {err}"
    print("KERNEL_OK")
</pallas_src>

<mosaic_0001>
module attributes {stable_mosaic.version = 11 : i64} {
  func.func @transformer_block_kernel(%arg0: i32, %arg1: memref<1x8x32xf32, #tpu.memory_space<vmem>>, %arg2: memref<32x96xbf16, #tpu.memory_space<vmem>>, %arg3: memref<1x96xf32, #tpu.memory_space<vmem>>, %arg4: memref<32x32xbf16, #tpu.memory_space<vmem>>, %arg5: memref<1x32xf32, #tpu.memory_space<vmem>>, %arg6: memref<1x32xf32, #tpu.memory_space<vmem>>, %arg7: memref<1x32xf32, #tpu.memory_space<vmem>>, %arg8: memref<32x128xbf16, #tpu.memory_space<vmem>>, %arg9: memref<1x128xf32, #tpu.memory_space<vmem>>, %arg10: memref<128x32xbf16, #tpu.memory_space<vmem>>, %arg11: memref<1x32xf32, #tpu.memory_space<vmem>>, %arg12: memref<1x32xf32, #tpu.memory_space<vmem>>, %arg13: memref<1x32xf32, #tpu.memory_space<vmem>>, %arg14: memref<1x8x32xf32, #tpu.memory_space<vmem>>) attributes {dimension_semantics = [#tpu.dimension_semantics<parallel>], iteration_bounds = array<i64: 2>, scalar_prefetch = 0 : i64, scratch_operands = 0 : i64, tpu.core_type = #tpu.core_type<tc>, window_params = [{transform_indices = @transform_0, window_bounds = array<i64: 1, 8, 32>}, {pipeline_mode = #tpu.pipeline_mode<synchronous>, transform_indices = @transform_1, window_bounds = array<i64: 32, 96>}, {pipeline_mode = #tpu.pipeline_mode<synchronous>, transform_indices = @transform_2, window_bounds = array<i64: 1, 96>}, {pipeline_mode = #tpu.pipeline_mode<synchronous>, transform_indices = @transform_3, window_bounds = array<i64: 32, 32>}, {pipeline_mode = #tpu.pipeline_mode<synchronous>, transform_indices = @transform_4, window_bounds = array<i64: 1, 32>}, {pipeline_mode = #tpu.pipeline_mode<synchronous>, transform_indices = @transform_5, window_bounds = array<i64: 1, 32>}, {pipeline_mode = #tpu.pipeline_mode<synchronous>, transform_indices = @transform_6, window_bounds = array<i64: 1, 32>}, {pipeline_mode = #tpu.pipeline_mode<synchronous>, transform_indices = @transform_7, window_bounds = array<i64: 32, 128>}, {pipeline_mode = #tpu.pipeline_mode<synchronous>, transform_indices = @transform_8, window_bounds = array<i64: 1, 128>}, {pipeline_mode = #tpu.pipeline_mode<synchronous>, transform_indices = @transform_9, window_bounds = array<i64: 128, 32>}, {pipeline_mode = #tpu.pipeline_mode<synchronous>, transform_indices = @transform_10, window_bounds = array<i64: 1, 32>}, {pipeline_mode = #tpu.pipeline_mode<synchronous>, transform_indices = @transform_11, window_bounds = array<i64: 1, 32>}, {pipeline_mode = #tpu.pipeline_mode<synchronous>, transform_indices = @transform_12, window_bounds = array<i64: 1, 32>}, {transform_indices = @transform_13, window_bounds = array<i64: 1, 8, 32>}]} {
    %c0 = arith.constant 0 : index
    %c0_0 = arith.constant 0 : index
    %c0_1 = arith.constant 0 : index
    %0 = vector.load %arg1[%c0, %c0_0, %c0_1] : memref<1x8x32xf32, #tpu.memory_space<vmem>>, vector<1x8x32xf32>
    %1 = vector.shape_cast %0 : vector<1x8x32xf32> to vector<8x32xf32>
    %c0_2 = arith.constant 0 : index
    %c0_3 = arith.constant 0 : index
    %2 = vector.load %arg2[%c0_2, %c0_3] : memref<32x96xbf16, #tpu.memory_space<vmem>>, vector<32x96xbf16>
    %3 = arith.truncf %1 : vector<8x32xf32> to vector<8x32xbf16>
    %cst = arith.constant dense<0.000000e+00> : vector<8x96xf32>
    %4 = tpu.matmul %3, %2, %cst {dimension_numbers = #tpu.dot_dimension_numbers<[1], [0], [0], [1], [0, 0, 1, 1], [], []>} : vector<8x32xbf16>, vector<32x96xbf16>, vector<8x96xf32> -> vector<8x96xf32>
    %c0_4 = arith.constant 0 : index
    %c0_5 = arith.constant 0 : index
    %5 = vector.load %arg3[%c0_4, %c0_5] : memref<1x96xf32, #tpu.memory_space<vmem>>, vector<1x96xf32>
    %6 = vector.broadcast %5 : vector<1x96xf32> to vector<8x96xf32>
    %7 = arith.addf %4, %6 : vector<8x96xf32>
    %8 = vector.extract_strided_slice %7 {offsets = [0, 0], sizes = [8, 32], strides = [1, 1]} : vector<8x96xf32> to vector<8x32xf32>
    %9 = vector.shape_cast %8 : vector<8x32xf32> to vector<1x8x4x8xf32>
    %10 = tpu.transpose %9, [0, 2, 1, 3] : vector<1x8x4x8xf32> -> vector<1x4x8x8xf32>
    %11 = vector.shape_cast %10 : vector<1x4x8x8xf32> to vector<4x8x8xf32>
    %12 = arith.truncf %11 : vector<4x8x8xf32> to vector<4x8x8xbf16>
    %13 = vector.extract_strided_slice %7 {offsets = [0, 32], sizes = [8, 32], strides = [1, 1]} : vector<8x96xf32> to vector<8x32xf32>
    %14 = vector.shape_cast %13 : vector<8x32xf32> to vector<1x8x4x8xf32>
    %15 = tpu.transpose %14, [0, 2, 1, 3] : vector<1x8x4x8xf32> -> vector<1x4x8x8xf32>
    %16 = vector.shape_cast %15 : vector<1x4x8x8xf32> to vector<4x8x8xf32>
    %17 = arith.truncf %16 : vector<4x8x8xf32> to vector<4x8x8xbf16>
    %18 = vector.extract_strided_slice %7 {offsets = [0, 64], sizes = [8, 32], strides = [1, 1]} : vector<8x96xf32> to vector<8x32xf32>
    %19 = vector.shape_cast %18 : vector<8x32xf32> to vector<1x8x4x8xf32>
    %20 = tpu.transpose %19, [0, 2, 1, 3] : vector<1x8x4x8xf32> -> vector<1x4x8x8xf32>
    %21 = vector.shape_cast %20 : vector<1x4x8x8xf32> to vector<4x8x8xf32>
    %22 = arith.truncf %21 : vector<4x8x8xf32> to vector<4x8x8xbf16>
    "tpu.trace_start"() <{level = 10 : i32, message = "bqd,bkd->bqk"}> : () -> ()
    %cst_6 = arith.constant dense<0.000000e+00> : vector<4x8x8xf32>
    %23 = tpu.matmul %12, %17, %cst_6 {dimension_numbers = #tpu.dot_dimension_numbers<[2], [2], [1], [1], [0, 0, 0, 1, 1, 1], [0], [0]>} : vector<4x8x8xbf16>, vector<4x8x8xbf16>, vector<4x8x8xf32> -> vector<4x8x8xf32>
    "tpu.trace_stop"() : () -> ()
    %cst_7 = arith.constant dense<0xFF800000> : vector<4x8xf32>
    %24 = vector.multi_reduction <maximumf>, %23, %cst_7 [2] : vector<4x8x8xf32> to vector<4x8xf32>
    %25 = vector.shape_cast %24 : vector<4x8xf32> to vector<4x8x1xf32>
    %26 = vector.broadcast %25 : vector<4x8x1xf32> to vector<4x8x8xf32>
    %27 = arith.subf %23, %26 : vector<4x8x8xf32>
    %28 = math.exp %27 : vector<4x8x8xf32>
    %cst_8 = arith.constant dense<0.000000e+00> : vector<4x8xf32>
    %29 = vector.multi_reduction <add>, %28, %cst_8 [2] : vector<4x8x8xf32> to vector<4x8xf32>
    %30 = vector.shape_cast %29 : vector<4x8xf32> to vector<4x8x1xf32>
    %31 = arith.truncf %28 : vector<4x8x8xf32> to vector<4x8x8xbf16>
    "tpu.trace_start"() <{level = 10 : i32, message = "bqk,bkd->bqd"}> : () -> ()
    %cst_9 = arith.constant dense<0.000000e+00> : vector<4x8x8xf32>
    %32 = tpu.matmul %31, %22, %cst_9 {dimension_numbers = #tpu.dot_dimension_numbers<[2], [1], [1], [2], [0, 0, 0, 1, 1, 2], [0], [0]>} : vector<4x8x8xbf16>, vector<4x8x8xbf16>, vector<4x8x8xf32> -> vector<4x8x8xf32>
    "tpu.trace_stop"() : () -> ()
    %33 = tpu.reciprocal %30 {approx = true} : vector<4x8x1xf32> -> vector<4x8x1xf32>
    %34 = vector.broadcast %33 : vector<4x8x1xf32> to vector<4x8x8xf32>
    %35 = arith.mulf %32, %34 : vector<4x8x8xf32>
    %36 = vector.shape_cast %35 : vector<4x8x8xf32> to vector<1x4x8x8xf32>
    %37 = tpu.transpose %36, [0, 2, 1, 3] : vector<1x4x8x8xf32> -> vector<1x8x4x8xf32>
    %38 = vector.shape_cast %37 : vector<1x8x4x8xf32> to vector<8x32xf32>
    %c0_10 = arith.constant 0 : index
    %c0_11 = arith.constant 0 : index
    %39 = vector.load %arg4[%c0_10, %c0_11] : memref<32x32xbf16, #tpu.memory_space<vmem>>, vector<32x32xbf16>
    %40 = arith.truncf %38 : vector<8x32xf32> to vector<8x32xbf16>
    %cst_12 = arith.constant dense<0.000000e+00> : vector<8x32xf32>
    %41 = tpu.matmul %40, %39, %cst_12 {dimension_numbers = #tpu.dot_dimension_numbers<[1], [0], [0], [1], [0, 0, 1, 1], [], []>} : vector<8x32xbf16>, vector<32x32xbf16>, vector<8x32xf32> -> vector<8x32xf32>
    %c0_13 = arith.constant 0 : index
    %c0_14 = arith.constant 0 : index
    %42 = vector.load %arg5[%c0_13, %c0_14] : memref<1x32xf32, #tpu.memory_space<vmem>>, vector<1x32xf32>
    %43 = vector.broadcast %42 : vector<1x32xf32> to vector<8x32xf32>
    %44 = arith.addf %41, %43 : vector<8x32xf32>
    %45 = arith.addf %1, %44 : vector<8x32xf32>
    %c0_15 = arith.constant 0 : index
    %c0_16 = arith.constant 0 : index
    %46 = vector.load %arg6[%c0_15, %c0_16] : memref<1x32xf32, #tpu.memory_space<vmem>>, vector<1x32xf32>
    %c0_17 = arith.constant 0 : index
    %c0_18 = arith.constant 0 : index
    %47 = vector.load %arg7[%c0_17, %c0_18] : memref<1x32xf32, #tpu.memory_space<vmem>>, vector<1x32xf32>
    %cst_19 = arith.constant dense<0.000000e+00> : vector<8xf32>
    %48 = vector.multi_reduction <add>, %45, %cst_19 [1] : vector<8x32xf32> to vector<8xf32>
    %49 = vector.shape_cast %48 : vector<8xf32> to vector<8x1xf32>
    %cst_20 = arith.constant 3.200000e+01 : f32
    %50 = vector.broadcast %cst_20 : f32 to vector<8x1xf32>
    %51 = arith.divf %49, %50 : vector<8x1xf32>
    %52 = vector.broadcast %51 : vector<8x1xf32> to vector<8x32xf32>
    %53 = arith.subf %45, %52 : vector<8x32xf32>
    %54 = arith.mulf %53, %53 : vector<8x32xf32>
    %cst_21 = arith.constant dense<0.000000e+00> : vector<8xf32>
    %55 = vector.multi_reduction <add>, %54, %cst_21 [1] : vector<8x32xf32> to vector<8xf32>
    %56 = vector.shape_cast %55 : vector<8xf32> to vector<8x1xf32>
    %cst_22 = arith.constant 3.200000e+01 : f32
    %57 = vector.broadcast %cst_22 : f32 to vector<8x1xf32>
    %58 = arith.divf %56, %57 : vector<8x1xf32>
    %cst_23 = arith.constant 9.99999974E-6 : f32
    %59 = vector.broadcast %cst_23 : f32 to vector<8x1xf32>
    %60 = arith.addf %58, %59 : vector<8x1xf32>
    %61 = math.rsqrt %60 : vector<8x1xf32>
    %62 = vector.broadcast %61 : vector<8x1xf32> to vector<8x32xf32>
    %63 = arith.mulf %53, %62 : vector<8x32xf32>
    %64 = vector.broadcast %46 : vector<1x32xf32> to vector<8x32xf32>
    %65 = arith.mulf %63, %64 : vector<8x32xf32>
    %66 = vector.broadcast %47 : vector<1x32xf32> to vector<8x32xf32>
    %67 = arith.addf %65, %66 : vector<8x32xf32>
    %c0_24 = arith.constant 0 : index
    %c0_25 = arith.constant 0 : index
    %68 = vector.load %arg8[%c0_24, %c0_25] : memref<32x128xbf16, #tpu.memory_space<vmem>>, vector<32x128xbf16>
    %69 = arith.truncf %67 : vector<8x32xf32> to vector<8x32xbf16>
    %cst_26 = arith.constant dense<0.000000e+00> : vector<8x128xf32>
    %70 = tpu.matmul %69, %68, %cst_26 {dimension_numbers = #tpu.dot_dimension_numbers<[1], [0], [0], [1], [0, 0, 1, 1], [], []>} : vector<8x32xbf16>, vector<32x128xbf16>, vector<8x128xf32> -> vector<8x128xf32>
    %c0_27 = arith.constant 0 : index
    %c0_28 = arith.constant 0 : index
    %71 = vector.load %arg9[%c0_27, %c0_28] : memref<1x128xf32, #tpu.memory_space<vmem>>, vector<1x128xf32>
    %72 = vector.broadcast %71 : vector<1x128xf32> to vector<8x128xf32>
    %73 = arith.addf %70, %72 : vector<8x128xf32>
    %cst_29 = arith.constant 0.000000e+00 : f32
    %74 = vector.broadcast %cst_29 : f32 to vector<8x128xf32>
    %75 = arith.maximumf %73, %74 : vector<8x128xf32>
    %c0_30 = arith.constant 0 : index
    %c0_31 = arith.constant 0 : index
    %76 = vector.load %arg10[%c0_30, %c0_31] : memref<128x32xbf16, #tpu.memory_space<vmem>>, vector<128x32xbf16>
    %77 = arith.truncf %75 : vector<8x128xf32> to vector<8x128xbf16>
    %cst_32 = arith.constant dense<0.000000e+00> : vector<8x32xf32>
    %78 = tpu.matmul %77, %76, %cst_32 {dimension_numbers = #tpu.dot_dimension_numbers<[1], [0], [0], [1], [0, 0, 1, 1], [], []>} : vector<8x128xbf16>, vector<128x32xbf16>, vector<8x32xf32> -> vector<8x32xf32>
    %c0_33 = arith.constant 0 : index
    %c0_34 = arith.constant 0 : index
    %79 = vector.load %arg11[%c0_33, %c0_34] : memref<1x32xf32, #tpu.memory_space<vmem>>, vector<1x32xf32>
    %80 = vector.broadcast %79 : vector<1x32xf32> to vector<8x32xf32>
    %81 = arith.addf %78, %80 : vector<8x32xf32>
    %82 = arith.addf %67, %81 : vector<8x32xf32>
    %c0_35 = arith.constant 0 : index
    %c0_36 = arith.constant 0 : index
    %83 = vector.load %arg12[%c0_35, %c0_36] : memref<1x32xf32, #tpu.memory_space<vmem>>, vector<1x32xf32>
    %c0_37 = arith.constant 0 : index
    %c0_38 = arith.constant 0 : index
    %84 = vector.load %arg13[%c0_37, %c0_38] : memref<1x32xf32, #tpu.memory_space<vmem>>, vector<1x32xf32>
    %cst_39 = arith.constant dense<0.000000e+00> : vector<8xf32>
    %85 = vector.multi_reduction <add>, %82, %cst_39 [1] : vector<8x32xf32> to vector<8xf32>
    %86 = vector.shape_cast %85 : vector<8xf32> to vector<8x1xf32>
    %cst_40 = arith.constant 3.200000e+01 : f32
    %87 = vector.broadcast %cst_40 : f32 to vector<8x1xf32>
    %88 = arith.divf %86, %87 : vector<8x1xf32>
    %89 = vector.broadcast %88 : vector<8x1xf32> to vector<8x32xf32>
    %90 = arith.subf %82, %89 : vector<8x32xf32>
    %91 = arith.mulf %90, %90 : vector<8x32xf32>
    %cst_41 = arith.constant dense<0.000000e+00> : vector<8xf32>
    %92 = vector.multi_reduction <add>, %91, %cst_41 [1] : vector<8x32xf32> to vector<8xf32>
    %93 = vector.shape_cast %92 : vector<8xf32> to vector<8x1xf32>
    %cst_42 = arith.constant 3.200000e+01 : f32
    %94 = vector.broadcast %cst_42 : f32 to vector<8x1xf32>
    %95 = arith.divf %93, %94 : vector<8x1xf32>
    %cst_43 = arith.constant 9.99999974E-6 : f32
    %96 = vector.broadcast %cst_43 : f32 to vector<8x1xf32>
    %97 = arith.addf %95, %96 : vector<8x1xf32>
    %98 = math.rsqrt %97 : vector<8x1xf32>
    %99 = vector.broadcast %98 : vector<8x1xf32> to vector<8x32xf32>
    %100 = arith.mulf %90, %99 : vector<8x32xf32>
    %101 = vector.broadcast %83 : vector<1x32xf32> to vector<8x32xf32>
    %102 = arith.mulf %100, %101 : vector<8x32xf32>
    %103 = vector.broadcast %84 : vector<1x32xf32> to vector<8x32xf32>
    %104 = arith.addf %102, %103 : vector<8x32xf32>
    %105 = vector.shape_cast %104 : vector<8x32xf32> to vector<1x8x32xf32>
    %c0_44 = arith.constant 0 : index
    %c0_45 = arith.constant 0 : index
    %c0_46 = arith.constant 0 : index
    %106 = vector.load %arg14[%c0_44, %c0_45, %c0_46] : memref<1x8x32xf32, #tpu.memory_space<vmem>>, vector<1x8x32xf32>
    tpu.vector_store %arg14[%c0_44, %c0_45, %c0_46], %105 {strides = array<i32>} : memref<1x8x32xf32, #tpu.memory_space<vmem>>, vector<1x8x32xf32>,
    return
  }
  func.func @transform_0(%arg0: i32) -> (i32, i32, i32) {
    %c0_i32 = arith.constant 0 : i32
    %c0_i32_0 = arith.constant 0 : i32
    %c0_i32_1 = arith.constant 0 : i32
    return %arg0, %c0_i32, %c0_i32_0 : i32, i32, i32
  }
  func.func @transform_1(%arg0: i32) -> (i32, i32) {
    %c0_i32 = arith.constant 0 : i32
    %c0_i32_0 = arith.constant 0 : i32
    %c0_i32_1 = arith.constant 0 : i32
    return %c0_i32, %c0_i32_0 : i32, i32
  }
  func.func @transform_2(%arg0: i32) -> (i32, i32) {
    %c0_i32 = arith.constant 0 : i32
    %c0_i32_0 = arith.constant 0 : i32
    %c0_i32_1 = arith.constant 0 : i32
    return %c0_i32, %c0_i32_0 : i32, i32
  }
  func.func @transform_3(%arg0: i32) -> (i32, i32) {
    %c0_i32 = arith.constant 0 : i32
    %c0_i32_0 = arith.constant 0 : i32
    %c0_i32_1 = arith.constant 0 : i32
    return %c0_i32, %c0_i32_0 : i32, i32
  }
  func.func @transform_4(%arg0: i32) -> (i32, i32) {
    %c0_i32 = arith.constant 0 : i32
    %c0_i32_0 = arith.constant 0 : i32
    %c0_i32_1 = arith.constant 0 : i32
    return %c0_i32, %c0_i32_0 : i32, i32
  }
  func.func @transform_5(%arg0: i32) -> (i32, i32) {
    %c0_i32 = arith.constant 0 : i32
    %c0_i32_0 = arith.constant 0 : i32
    %c0_i32_1 = arith.constant 0 : i32
    return %c0_i32, %c0_i32_0 : i32, i32
  }
  func.func @transform_6(%arg0: i32) -> (i32, i32) {
    %c0_i32 = arith.constant 0 : i32
    %c0_i32_0 = arith.constant 0 : i32
    %c0_i32_1 = arith.constant 0 : i32
    return %c0_i32, %c0_i32_0 : i32, i32
  }
  func.func @transform_7(%arg0: i32) -> (i32, i32) {
    %c0_i32 = arith.constant 0 : i32
    %c0_i32_0 = arith.constant 0 : i32
    %c0_i32_1 = arith.constant 0 : i32
    return %c0_i32, %c0_i32_0 : i32, i32
  }
  func.func @transform_8(%arg0: i32) -> (i32, i32) {
    %c0_i32 = arith.constant 0 : i32
    %c0_i32_0 = arith.constant 0 : i32
    %c0_i32_1 = arith.constant 0 : i32
    return %c0_i32, %c0_i32_0 : i32, i32
  }
  func.func @transform_9(%arg0: i32) -> (i32, i32) {
    %c0_i32 = arith.constant 0 : i32
    %c0_i32_0 = arith.constant 0 : i32
    %c0_i32_1 = arith.constant 0 : i32
    return %c0_i32, %c0_i32_0 : i32, i32
  }
  func.func @transform_10(%arg0: i32) -> (i32, i32) {
    %c0_i32 = arith.constant 0 : i32
    %c0_i32_0 = arith.constant 0 : i32
    %c0_i32_1 = arith.constant 0 : i32
    return %c0_i32, %c0_i32_0 : i32, i32
  }
  func.func @transform_11(%arg0: i32) -> (i32, i32) {
    %c0_i32 = arith.constant 0 : i32
    %c0_i32_0 = arith.constant 0 : i32
    %c0_i32_1 = arith.constant 0 : i32
    return %c0_i32, %c0_i32_0 : i32, i32
  }
  func.func @transform_12(%arg0: i32) -> (i32, i32) {
    %c0_i32 = arith.constant 0 : i32
    %c0_i32_0 = arith.constant 0 : i32
    %c0_i32_1 = arith.constant 0 : i32
    return %c0_i32, %c0_i32_0 : i32, i32
  }
  func.func @transform_13(%arg0: i32) -> (i32, i32, i32) {
    %c0_i32 = arith.constant 0 : i32
    %c0_i32_0 = arith.constant 0 : i32
    %c0_i32_1 = arith.constant 0 : i32
    return %arg0, %c0_i32, %c0_i32_0 : i32, i32, i32
  }
}

</mosaic_0001>

<bundles_post_ra>
// kernel: tpu_custom_call.1
= control target key start
LH: loop header
LB: loop body
LE: loop exit
PB: predicated region body
PF: predicated region fallthrough
CT: control target
= control target key end

     0   :  { %s2664_s0 = inlined_call_operand.vmem [shape: f32[2,8,32], index: 0, kind: input, shape index: {}]   ;;  %s2665_s1 = inlined_call_operand.vmem [shape: bf16[32,96], index: 1, kind: input, shape index: {}]   ;;  %s2666_s2 = inlined_call_operand.vmem [shape: f32[1,96], index: 2, kind: input, shape index: {}]   ;;  %s2667_s3 = inlined_call_operand.vmem [shape: bf16[32,32], index: 3, kind: input, shape index: {}]   ;;  %s2668_s4 = inlined_call_operand.vmem [shape: f32[1,32], index: 4, kind: input, shape index: {}]   ;;  %s2669_s5 = inlined_call_operand.vmem [shape: f32[1,32], index: 5, kind: input, shape index: {}]   ;;  %s2670_s6 = inlined_call_operand.vmem [shape: f32[1,32], index: 6, kind: input, shape index: {}]   ;;  %s2671_s7 = inlined_call_operand.vmem [shape: bf16[32,128], index: 7, kind: input, shape index: {}]   ;;  %s2672_s8 = inlined_call_operand.vmem [shape: f32[1,128], index: 8, kind: input, shape index: {}]   ;;  %s2673_s9 = inlined_call_operand.vmem [shape: bf16[128,32], index: 9, kind: input, shape index: {}]   ;;  %s2674_s10 = inlined_call_operand.vmem [shape: f32[1,32], index: 10, kind: input, shape index: {}]   ;;  %s2675_s11 = inlined_call_operand.vmem [shape: f32[1,32], index: 11, kind: input, shape index: {}]   ;;  %s2676_s12 = inlined_call_operand.vmem [shape: f32[1,32], index: 12, kind: input, shape index: {}]   ;;  %s2677_s13 = inlined_call_operand.hbm [shape: f32[2,8,32], index: 13, kind: output, shape index: {}]  }
   0x1   :  { %2678 = sst [smem:[#allocation5_spill]] %s2664_s0 }
   0x2   :  { %2679 = sst [smem:[#allocation6_spill]] %s2665_s1 }
   0x3   :  { %2680 = sst [smem:[#allocation7_spill]] %s2666_s2 }
   0x4   :  { %2681 = sst [smem:[#allocation8_spill]] %s2667_s3 }
   0x5   :  { %18 = vsyncpa [#allocation3], 0 }
   0x6   :  { %20 = vsyncpa [#allocation3 + $0x1], 0  ;;  %s2322_s25 = smov 0   ;;  %s2324_s26 = smov 0  }
   0x7   :  { %s2326_s27 = smov 0   ;;  %s2328_s28 = smov 0  }
   0x8 LB: > { %s2343_s29 = sadd.s32 4294967295, %s2237_s28   ;;  %s1913_s30 = sadd.s32 4294967294, %s2237_s28   ;;  %s2237_s28 = sphi %s2328_s28, %s2691_s28   ;;  %s2233_s27 = sphi %s2326_s27, %s2690_s27   ;;  %s2229_s26 = sphi %s2324_s26, %s2689_s26   ;;  %s2225_s25 = sphi %s2322_s25, %s2688_s25  }
   0x9   : > { %s2347_s14 = sadd.s32 1, %s2237_s28   ;;  %s311_s15 = sadd.s32 1, %s2233_s27 }
   0xa   : > { %s308_s16 = ssub.s32 %s2237_s28, %s2347_s14  ;;  %p321_p0 = scmp.ne.s32.totalorder %s2233_s27, %s2229_s26 }
   0xb   : > { %p309_p1 = scmp.eq.s32.totalorder %s308_s16, 0  ;;  %p322_p2 = scmp.eq.s32.totalorder %s2343_s29, 1 }
   0xc   : > { %p327_p3 = scmp.ne.s32.totalorder %s2229_s26, %s2225_s25  ;;  %p328_p4 = scmp.eq.s32.totalorder %s1913_s30, 1 }
   0xd   : > { %s2358_s17 = scalar_select %p309_p1, %s2233_s27, %s311_s15  }
   0xe   : > { %p2360_p5 = por %p322_p2, %p321_p0  ;;  %p2364_p6 = por %p328_p4, %p327_p3 }
   0xf   : > { %p1916_p7 = scmp.ge.s32.totalorder %s2237_s28, 1  ;;  %p389_p8 = scmp.lt.s32.totalorder %s2237_s28, 3 }
  0x11   : > { %p390_p9 = pnand %p1916_p7, %p389_p8 }
  0x12   : > { %s2684_s1 = sld [smem:[#allocation6_spill]] (!%p390_p9)  ;;  %v2239_v1 = vmov (!%p390_p9), 0.0   ;;  %vm2240_vm0 = vmmov (!%p390_p9), 0   ;;  %p432_p10 = scmp.lt.s32.totalorder (!%p390_p9), %s2343_s29, 1  ;;  %vm462_vm1 = vcmask (!%p390_p9), 261120   ;;  %v521_v16 = vlaneseq (!%p390_p9) }
  0x13   : > { %393 = sbr.rel (%p390_p9) target bundleno = 2588 (0xa1c), region = 72  ;;  %1998 = vmatprep.subr.bf16.mxu0 (!%p390_p9), %v2239_v1  ;;  %2018 = vmatprep.subr.bf16.mxu1 (!%p390_p9), %v2239_v1  ;;  %s2685_s0 = sld [smem:[#allocation5_spill]] (!%p390_p9)  ;;  %v2246_v14 = vmov (!%p390_p9), 1983009808   ;;  %v2247_v19 = vmov (!%p390_p9), 1934713408  }
  0x14   : > { %2002 = vmatprep.mubr.msk.bf16.mxu0 (!%p390_p9), %vm2240_vm0, %v2239_v1  ;;  %2020 = vmatprep.mubr.msk.bf16.mxu1 (!%p390_p9), %vm2240_vm0, %v2239_v1  ;;  %s2686_s2 = sld [smem:[#allocation7_spill]] (!%p390_p9)  ;;  %s2241_s23 = smov (!%p390_p9), 104   ;;  %v519_v15 = vunpack.c.l.s4 (!%p390_p9), %v2246_v14  ;;  %v522_v18 = vshrl.u32 (!%p390_p9), %v521_v16, 7  ;;  %v551_v20 = vunpack.c.l.s4 (!%p390_p9), %v2247_v19  ;;  %vm960_vm2 = vcmask (!%p390_p9), 64512  }
  0x15   : > { %s2244_s15 = smov (!%p390_p9), 112   ;;  %s2245_s16 = smov (!%p390_p9), 64   ;;  %vm1188_vm3 = vcmask (!%p390_p9), 1043456   ;;  %vm1527_vm4 = vcmask (!%p390_p9), 130048   ;;  %vm1529_vm5 = vcmask (!%p390_p9), 195584  }
  0x16   : > { %v520_v17 = vunpack.c.0.s8 (!%p390_p9), %v519_v15  ;;  %v552_v26 = vunpack.c.0.s8 (!%p390_p9), %v551_v20  ;;  %s2687_s3 = sld [smem:[#allocation8_spill]] (!%p390_p9) }
  0x18   : > { %v2141_v0 = vld [vmem:[%s2684_s1] sm:$0xff] (!%p390_p9)   ;;  %v2142_v2 = vld [vmem:[%s2684_s1 + $0x8] sm:$0xff] (!%p390_p9)   ;;  %v2409_v23 = vsub.s32 (!%p390_p9), %v520_v17, %v522_v18  ;;  %v2417_v33 = vsub.s32 (!%p390_p9), %v552_v26, %v522_v18 }
  0x19   : > { %1999 = vmatpush3.bf16.msra.mxu0 (!%p390_p9), %v2141_v0 }
  0x1a   : > { %2000 = vmatprep.subr.bf16.mxu0 %v2239_v1  ;;  %s433_s24 = scalar_select %p432_p10, %s2343_s29, 1  ;;  %v1919_v5 = vld [vmem:[%s2686_s2] ss:$0 sm:$0xff] }
  0x1c   : > { %s1918_s30 = sshll.u32 %s433_s24, 3  ;;  %s2242_s24 = smov 120  }
  0x1d   : > { %2001 = vmatpush3.bf16.msra.mxu0 %v2142_v2  ;;  %s435_s20 = scalar_lea.vmem %s2685_s0, %s1918_s30  ;;  %s2243_s30 = smov 96  }
  0x1e   : > { %2006 = vmatprep.subr.bf16.mxu0 %v2239_v1  ;;  %v2389_v3 = vld [vmem:[%s435_s20] sm:$0xff] }
  0x1f   : > { %v442_v4 = vpack.c.bf16 %v2389_v3, %v2389_v3 }
  0x21   : > { %2003 = vmatmul.mubr.msk.bf16.vlgmr.msra.gmra.mrb[0].mxu0 %vm462_vm1, %v442_v4 }
  0x22   : > { %2008 = vmatprep.mubr.msk.bf16.mxu0 %vm2240_vm0, %v2239_v1 }
  0xf4   : > { %v500_v6 = vpop.f32.mrb[0].mxu0 }
  0xf5   : > { %v501_v7 = vadd.f32 %v1919_v5, %v500_v6  ;;  %v2004_v8 = vpop.f32.mrb[1].mxu0 }
  0xf6   : > { %v503_v9 = vpop.f32.mrb[2].mxu0 }
  0xf7   : > { %513 = vrot.lane.b32.xlu1 %v501_v7, %s2241_s23  ;;  %507 = vrot.lane.b32.xlu0 %v501_v7, %s2242_s24  ;;  %v2005_v10 = vpop.f32.mrb[3].mxu0  ;;  %s2248_s24 = smov 16   ;;  %s1961_s23 = sshll.u32 %s2343_s29, 7 }
  0xf8   : > { %s2251_s29 = smov [#allocation2]  }
  0xfb   : > { %656 = vrot.lane.b32.xlu1 %v501_v7, %s2243_s30  ;;  %510 = vrot.lane.b32.xlu0 %v501_v7, %s2244_s15  ;;  %s2250_s15 = smov 24  }
 0x169   : > { %v508_v11 = vpop.permute.xlu0 %507  ;;  %v2399_v12 = vpop.permute.xlu1 %513 }
 0x16a   : > { %658 = vrot.lane.b32.xlu0 %v508_v11, %s2243_s30  ;;  %v532_v24 = vcombine.low %v508_v11, %v2399_v12  ;;  %v533_v25 = vcombine.high %v508_v11, %v2399_v12 }
 0x16c   : > { %v540_v29 = vrot.slane %v532_v24, %v2409_v23  ;;  %v547_v30 = vrot.slane %v533_v25, %v2409_v23 }
 0x16d   : > { %v2401_v13 = vpop.permute.xlu0 %510  ;;  %v657_v31 = vpop.permute.xlu1 %656 }
 0x16e   : > { %662 = vrot.lane.b32.xlu0 %v2399_v12, %s2243_s30  ;;  %660 = vrot.lane.b32.xlu1 %v2401_v13, %s2243_s30  ;;  %v516_v21 = vcombine.low %v501_v7, %v2401_v13  ;;  %v517_v22 = vcombine.high %v501_v7, %v2401_v13  ;;  %s2249_s30 = smov 8  }
 0x170   : > { %v524_v27 = vrot.slane %v516_v21, %v2409_v23  ;;  %v531_v28 = vrot.slane %v517_v22, %v2409_v23 }
 0x172   : > { %808 = vrot.lane.b32.xlu0 %v501_v7, %s2245_s16  ;;  %810 = vrot.lane.b32.xlu1 %v508_v11, %s2245_s16  ;;  %v548_v34 = vcombine.low %v524_v27, %v540_v29  ;;  %v549_v35 = vcombine.high %v524_v27, %v540_v29  ;;  %v564_v36 = vcombine.low %v531_v28, %v547_v30 }
 0x173   : > { %v565_v37 = vcombine.high %v531_v28, %v547_v30 }
 0x174   : > { %v556_v44 = vrot.slane %v548_v34, %v2417_v33  ;;  %v563_v45 = vrot.slane %v549_v35, %v2417_v33  ;;  %v572_v46 = vrot.slane %v564_v36, %v2417_v33 }
 0x175   : > { %v579_v47 = vrot.slane %v565_v37, %v2417_v33 }
 0x176   : > { %v584_v56 = vcombine.low %v556_v44, %v563_v45  ;;  %v1923_v57 = vcombine.high %v556_v44, %v563_v45 }
 0x177   : > { %v600_v58 = vcombine.low %v572_v46, %v579_v47  ;;  %v1924_v59 = vcombine.high %v572_v46, %v579_v47 }
 0x178   : > { %v591_v6 = vrot.slane %v584_v56, %v2409_v23  ;;  %v599_v7 = vrot.slane %v1923_v57, %v2409_v23 }
 0x179   : > { %v607_v8 = vrot.slane %v600_v58, %v2409_v23  ;;  %v615_v9 = vrot.slane %v1924_v59, %v2409_v23 }
 0x17a   : > { %v616_v20 = vcombine.low %v591_v6, %v599_v7  ;;  %v617_v22 = vcombine.high %v591_v6, %v599_v7 }
 0x17b   : > { %v632_v21 = vcombine.low %v607_v8, %v615_v9  ;;  %v633_v24 = vcombine.high %v607_v8, %v615_v9 }
 0x17c   : > { %v631_v36 = vrot.slane %v617_v22, %v2417_v33 }
 0x17d   : > { %v647_v37 = vrot.slane %v633_v24, %v2417_v33 }
 0x1dc   : > { %v659_v32 = vpop.permute.xlu0 %658 }
 0x1e0   : > { %v661_v38 = vpop.permute.xlu1 %660  ;;  %v663_v39 = vpop.permute.xlu0 %662 }
 0x1e1   : > { %v668_v40 = vcombine.low %v657_v31, %v661_v38  ;;  %v669_v41 = vcombine.high %v657_v31, %v661_v38  ;;  %v684_v42 = vcombine.low %v659_v32, %v663_v39  ;;  %v685_v43 = vcombine.high %v659_v32, %v663_v39 }
 0x1e2   : > { %v624_v31 = vrot.slane %v616_v20, %v2417_v33  ;;  %v640_v32 = vrot.slane %v632_v21, %v2417_v33 }
 0x1e3   : > { %v676_v48 = vrot.slane %v668_v40, %v2409_v23  ;;  %v683_v49 = vrot.slane %v669_v41, %v2409_v23  ;;  %v692_v50 = vrot.slane %v684_v42, %v2409_v23  ;;  %v699_v51 = vrot.slane %v685_v43, %v2409_v23 }
 0x1e4   : > { %v648_v41 = vcombine.low %v624_v31, %v640_v32  ;;  %v650_v42 = vcombine.low %v631_v36, %v647_v37 }
 0x1e5   : > { %v700_v52 = vcombine.low %v676_v48, %v692_v50  ;;  %v701_v53 = vcombine.high %v676_v48, %v692_v50  ;;  %v716_v54 = vcombine.low %v683_v49, %v699_v51  ;;  %v717_v55 = vcombine.high %v683_v49, %v699_v51 }
 0x1e6   : > { %v652_v44 = vpack.c.bf16 %v648_v41, %v648_v41  ;;  %v654_v45 = vpack.c.bf16 %v650_v42, %v650_v42  ;;  %v649_v48 = vcombine.high %v624_v31, %v640_v32 }
 0x1e7   : > { %v708_v60 = vrot.slane %v700_v52, %v2417_v33  ;;  %v715_v61 = vrot.slane %v701_v53, %v2417_v33  ;;  %v724_v62 = vrot.slane %v716_v54, %v2417_v33  ;;  %v731_v63 = vrot.slane %v717_v55, %v2417_v33 }
 0x1e8   : > { %v653_v50 = vpack.c.bf16 %v649_v48, %v649_v48  ;;  %v651_v52 = vcombine.high %v631_v36, %v647_v37 }
 0x1e9   : > { %v736_v0 = vcombine.low %v708_v60, %v715_v61  ;;  %v1925_v2 = vcombine.high %v708_v60, %v715_v61  ;;  %v752_v4 = vcombine.low %v724_v62, %v731_v63  ;;  %v1926_v5 = vcombine.high %v724_v62, %v731_v63 }
 0x1ea   : > { %v655_v53 = vpack.c.bf16 %v651_v52, %v651_v52 }
 0x1eb   : > { %v743_v10 = vrot.slane %v736_v0, %v2409_v23  ;;  %v751_v11 = vrot.slane %v1925_v2, %v2409_v23  ;;  %v759_v14 = vrot.slane %v752_v4, %v2409_v23  ;;  %v767_v15 = vrot.slane %v1926_v5, %v2409_v23 }
 0x1ed   : > { %v768_v16 = vcombine.low %v743_v10, %v751_v11  ;;  %v784_v17 = vcombine.low %v759_v14, %v767_v15  ;;  %v769_v18 = vcombine.high %v743_v10, %v751_v11  ;;  %v785_v19 = vcombine.high %v759_v14, %v767_v15  ;;  %v811_v14 = vpop.permute.xlu1 %810 }
 0x1ef   : > { %v776_v25 = vrot.slane %v768_v16, %v2417_v33  ;;  %v792_v26 = vrot.slane %v784_v17, %v2417_v33  ;;  %v783_v27 = vrot.slane %v769_v18, %v2417_v33  ;;  %v799_v28 = vrot.slane %v785_v19, %v2417_v33  ;;  %v809_v18 = vpop.permute.xlu0 %808 }
 0x1f1   : > { %v800_v29 = vcombine.low %v776_v25, %v792_v26  ;;  %v802_v30 = vcombine.low %v783_v27, %v799_v28  ;;  %v801_v40 = vcombine.high %v776_v25, %v792_v26  ;;  %v803_v47 = vcombine.high %v783_v27, %v799_v28 }
 0x1f3   : > { %v804_v34 = vpack.c.bf16 %v800_v29, %v800_v29  ;;  %v806_v35 = vpack.c.bf16 %v802_v30, %v802_v30  ;;  %v805_v43 = vpack.c.bf16 %v801_v40, %v801_v40  ;;  %v807_v49 = vpack.c.bf16 %v803_v47, %v803_v47 }
 0x1f5   : > { %v965_v38 = vsel %vm960_vm2, %v804_v34, 0  ;;  %v1057_v39 = vsel %vm960_vm2, %v806_v35, 0  ;;  %v1011_v46 = vsel %vm960_vm2, %v805_v43, 0  ;;  %v1103_v51 = vsel %vm960_vm2, %v807_v49, 0 }
 0x1f6   : > { %2007 = vmatpush3.bf16.xpose.msra.mxu0 %v965_v38  ;;  %2019 = vmatpush3.bf16.xpose.msra.mxu1 %v1057_v39 }
 0x1f7   : > { %2012 = vmatprep.subr.bf16.mxu0 %v2239_v1  ;;  %2030 = vmatprep.subr.bf16.mxu1 %v2239_v1 }
 0x1fd   : > { %2009 = vmatmul.mubr.msk.bf16.vlgmr.msra.gmra.mrb[4].mxu0 %vm960_vm2, %v652_v44  ;;  %2021 = vmatmul.mubr.msk.bf16.vlgmr.msra.gmra.mrb[0].mxu1 %vm960_vm2, %v654_v45 }
 0x1fe   : > { %2013 = vmatpush3.bf16.xpose.msra.mxu0 %v1011_v46  ;;  %2014 = vmatprep.mubr.msk.bf16.mxu0 %vm2240_vm0, %v2239_v1 }
 0x1ff   : > { %2024 = vmatprep.subr.bf16.mxu0 %v2239_v1  ;;  %2032 = vmatprep.mubr.msk.bf16.mxu1 %vm2240_vm0, %v2239_v1 }
 0x205   : > { %2015 = vmatmul.mubr.msk.bf16.vlgmr.msra.gmra.mrb[8].mxu0 %vm960_vm2, %v653_v50 }
 0x206   : > { %2025 = vmatpush3.bf16.xpose.msra.mxu0 %v1103_v51  ;;  %2026 = vmatprep.mubr.msk.bf16.mxu0 %vm2240_vm0, %v2239_v1 }
 0x207   : > { %2036 = vmatprep.subr.bf16.mxu0 %v2239_v1 }
 0x20d   : > { %2027 = vmatmul.mubr.msk.bf16.vlgmr.msra.gmra.mrb[12].mxu0 %vm960_vm2, %v655_v53 }
 0x20e   : > { %2038 = vmatprep.mubr.msk.bf16.mxu0 %vm2240_vm0, %v2239_v1 }
 0x2d0   : > { %v1001_v54 = vpop.f32.mrb[4].mxu0  ;;  %v2467_v55 = vpop.f32.mrb[0].mxu1 }
 0x2d1   : > { %v2010_v56 = vpop.f32.mrb[5].mxu0  ;;  %v2022_v57 = vpop.f32.mrb[1].mxu1  ;;  %v1145_v58 = vsel %vm960_vm2, %v1001_v54, -inf  ;;  %v1151_v10 = vsel %vm960_vm2, %v2467_v55, -inf }
 0x2d2   : > { %v1096_v59 = vpop.f32.mrb[2].mxu1  ;;  %1146 = vmax.xlane.f32.xlu1 %v1145_v58  ;;  %v1004_v60 = vpop.f32.mrb[6].mxu0 }
 0x2d3   : > { %v2011_v61 = vpop.f32.mrb[7].mxu0  ;;  %v2023_v62 = vpop.f32.mrb[3].mxu1 }
 0x2d8   : > { %v1047_v63 = vpop.f32.mrb[8].mxu0 }
 0x2d9   : > { %v2016_v0 = vpop.f32.mrb[9].mxu0  ;;  %v1148_v2 = vsel %vm960_vm2, %v1047_v63, -inf }
 0x2da   : > { %1149 = vmax.xlane.f32.xlu0 %v1148_v2  ;;  %v1050_v4 = vpop.f32.mrb[10].mxu0 }
 0x2db   : > { %v2017_v5 = vpop.f32.mrb[11].mxu0 }
 0x2e0   : > { %v2471_v6 = vpop.f32.mrb[12].mxu0 }
 0x2e1   : > { %v2028_v7 = vpop.f32.mrb[13].mxu0  ;;  %v1154_v11 = vsel %vm960_vm2, %v2471_v6, -inf }
 0x2e2   : > { %v1142_v8 = vpop.f32.mrb[14].mxu0 }
 0x2e3   : > { %812 = vrot.lane.b32.xlu1 %v2401_v13, %s2245_s16  ;;  %v2029_v9 = vpop.f32.mrb[15].mxu0 }
 0x2f0   : > { %814 = vrot.lane.b32.xlu0 %v2399_v12, %s2245_s16 }
 0x307   : > { %1152 = vmax.xlane.f32.xlu1 %v1151_v10 }
 0x30f   : > { %1155 = vmax.xlane.f32.xlu0 %v1154_v11 }
 0x35f   : > { %v1147_v15 = vpop.xlane.xlu1 %1146 }
 0x360   : > { %v1157_v16 = vsub.f32 %v1001_v54, %v1147_v15 }
 0x362   : > { %v1161_v17 = vmul.f32 1.442695, %v1157_v16 }
 0x363   : > { %v813_v19 = vpop.permute.xlu1 %812 }
 0x364   : > { %2155 = vpow2.f32 %v1161_v17  ;;  %v820_v21 = vcombine.low %v809_v18, %v813_v19  ;;  %v821_v22 = vcombine.high %v809_v18, %v813_v19 }
 0x366   : > { %v828_v28 = vrot.slane %v820_v21, %v2409_v23  ;;  %v835_v29 = vrot.slane %v821_v22, %v2409_v23 }
 0x367   : > { %v1150_v13 = vpop.xlane.xlu0 %1149 }
 0x368   : > { %v1158_v20 = vsub.f32 %v1047_v63, %v1150_v13 }
 0x36a   : > { %v1163_v12 = vmul.f32 1.442695, %v1158_v20 }
 0x36b   : > { %v815_v24 = vpop.permute.xlu0 %814 }
 0x36c   : > { %2157 = vpow2.f32 %v1163_v12  ;;  %v836_v25 = vcombine.low %v811_v14, %v815_v24  ;;  %v837_v26 = vcombine.high %v811_v14, %v815_v24 }
 0x36e   : > { %v2156_v27 = vpop.eup %2155  ;;  %v844_v30 = vrot.slane %v836_v25, %v2409_v23  ;;  %v851_v31 = vrot.slane %v837_v26, %v2409_v23 }
 0x36f   : > { %v1169_v32 = vsel %vm960_vm2, %v2156_v27, 0.0  ;;  %v1181_v10 = vpack.c.bf16 %v2156_v27, %v2156_v27 }
 0x370   : > { %v852_v34 = vcombine.low %v828_v28, %v844_v30  ;;  %v853_v35 = vcombine.high %v828_v28, %v844_v30  ;;  %v868_v36 = vcombine.low %v835_v29, %v851_v31  ;;  %v869_v37 = vcombine.high %v835_v29, %v851_v31  ;;  %1170 = vadd.xlane.f32.xlu0 %v1169_v32 }
 0x372   : > { %v860_v38 = vrot.slane %v852_v34, %v2417_v33  ;;  %v867_v39 = vrot.slane %v853_v35, %v2417_v33  ;;  %v876_v40 = vrot.slane %v868_v36, %v2417_v33  ;;  %v883_v41 = vrot.slane %v869_v37, %v2417_v33 }
 0x374   : > { %v888_v42 = vcombine.low %v860_v38, %v867_v39  ;;  %v1927_v43 = vcombine.high %v860_v38, %v867_v39  ;;  %v904_v44 = vcombine.low %v876_v40, %v883_v41  ;;  %v1928_v45 = vcombine.high %v876_v40, %v883_v41 }
 0x376   : > { %v2158_v46 = vpop.eup %2157  ;;  %v895_v47 = vrot.slane %v888_v42, %v2409_v23  ;;  %v903_v48 = vrot.slane %v1927_v43, %v2409_v23  ;;  %v911_v49 = vrot.slane %v904_v44, %v2409_v23  ;;  %v919_v50 = vrot.slane %v1928_v45, %v2409_v23 }
 0x377   : > { %v1172_v51 = vsel %vm960_vm2, %v2158_v46, 0.0  ;;  %v1182_v11 = vpack.c.bf16 %v2158_v46, %v2158_v46 }
 0x378   : > { %1173 = vadd.xlane.f32.xlu1 %v1172_v51  ;;  %v920_v52 = vcombine.low %v895_v47, %v903_v48  ;;  %v936_v53 = vcombine.low %v911_v49, %v919_v50  ;;  %v921_v54 = vcombine.high %v895_v47, %v903_v48  ;;  %v937_v56 = vcombine.high %v911_v49, %v919_v50 }
 0x37a   : > { %v928_v57 = vrot.slane %v920_v52, %v2417_v33  ;;  %v944_v58 = vrot.slane %v936_v53, %v2417_v33  ;;  %v935_v59 = vrot.slane %v921_v54, %v2417_v33  ;;  %v951_v60 = vrot.slane %v937_v56, %v2417_v33 }
 0x37c   : > { %v952_v61 = vcombine.low %v928_v57, %v944_v58  ;;  %v953_v62 = vcombine.high %v928_v57, %v944_v58  ;;  %v954_v63 = vcombine.low %v935_v59, %v951_v60  ;;  %v955_v0 = vcombine.high %v935_v59, %v951_v60 }
 0x37e   : > { %v956_v2 = vpack.c.bf16 %v952_v61, %v952_v61  ;;  %v957_v4 = vpack.c.bf16 %v953_v62, %v953_v62  ;;  %v958_v8 = vpack.c.bf16 %v954_v63, %v954_v63  ;;  %v959_v9 = vpack.c.bf16 %v955_v0, %v955_v0 }
 0x380   : > { %v1190_v5 = vsel %vm1188_vm3, %v956_v2, 0  ;;  %v1236_v7 = vsel %vm1188_vm3, %v957_v4, 0  ;;  %v1282_v14 = vsel %vm1188_vm3, %v958_v8, 0  ;;  %v1328_v15 = vsel %vm1188_vm3, %v959_v9, 0 }
 0x381   : > { %2031 = vmatpush3.bf16.msra.mxu1 %v1190_v5  ;;  %2037 = vmatpush3.bf16.msra.mxu0 %v1236_v7  ;;  %v2143_v5 = vld [vmem:[%s2687_s3] sm:$0xff]  }
 0x382   : > { %2042 = vmatprep.subr.bf16.mxu1 %v2239_v1  ;;  %2048 = vmatprep.subr.bf16.mxu0 %v2239_v1 }
 0x384   : > { %2033 = vmatmul.mubr.msk.bf16.vlgmr.msra.gmra.mrb[4].mxu1 %vm960_vm2, %v1181_v10  ;;  %2039 = vmatmul.mubr.msk.bf16.vlgmr.msra.gmra.mrb[16].mxu0 %vm960_vm2, %v1182_v11 }
 0x385   : > { %2043 = vmatpush3.bf16.msra.mxu1 %v1282_v14  ;;  %2049 = vmatpush3.bf16.msra.mxu0 %v1328_v15 }
 0x386   : > { %2044 = vmatprep.mubr.msk.bf16.mxu1 %vm2240_vm0, %v2239_v1  ;;  %2050 = vmatprep.mubr.msk.bf16.mxu0 %vm2240_vm0, %v2239_v1 }
 0x387   : > { %2054 = vmatprep.subr.bf16.mxu1 %v2239_v1  ;;  %2062 = vmatprep.subr.bf16.mxu0 %v2239_v1 }
 0x394   : > { %v1153_v16 = vpop.xlane.xlu1 %1152 }
 0x395   : > { %v1159_v17 = vsub.f32 %v2467_v55, %v1153_v16 }
 0x397   : > { %v1165_v18 = vmul.f32 1.442695, %v1159_v17  ;;  %v2144_v17 = vld [vmem:[%s2687_s3 + $0x8] sm:$0xff]   ;;  %s2621_s3 = scalar_lea.hbm %s2677_s13, %s1961_s23 }
 0x399   : > { %2159 = vpow2.f32 %v1165_v18 }
 0x39c   : > { %v1156_v19 = vpop.xlane.xlu0 %1155 }
 0x39d   : > { %v1160_v13 = vsub.f32 %v2471_v6, %v1156_v19 }
 0x39f   : > { %v1167_v20 = vmul.f32 1.442695, %v1160_v13 }
 0x3a1   : > { %2161 = vpow2.f32 %v1167_v20 }
 0x3a3   : > { %v2160_v21 = vpop.eup %2159 }
 0x3a4   : > { %v1175_v22 = vsel %vm960_vm2, %v2160_v21, 0.0  ;;  %v1183_v12 = vpack.c.bf16 %v2160_v21, %v2160_v21 }
 0x3a5   : > { %1176 = vadd.xlane.f32.xlu0 %v1175_v22 }
 0x3a6   : > { %2045 = vmatmul.mubr.msk.bf16.vlgmr.msra.gmra.mrb[8].mxu1 %vm960_vm2, %v1183_v12 }
 0x3a7   : > { %2058 = vmatprep.mubr.msk.bf16.mxu1 %vm2240_vm0, %v2239_v1  ;;  %2055 = vmatpush3.bf16.msra.mxu1 %v2143_v5 }
 0x3a8   : > { %2056 = vmatprep.subr.bf16.mxu1 %v2239_v1 }
 0x3ab   : > { %v2162_v24 = vpop.eup %2161  ;;  %2057 = vmatpush3.bf16.msra.mxu1 %v2144_v17 }
 0x3ac   : > { %v1178_v55 = vsel %vm960_vm2, %v2162_v24, 0.0  ;;  %v1184_v25 = vpack.c.bf16 %v2162_v24, %v2162_v24  ;;  %2070 = vmatprep.subr.bf16.mxu1 %v2239_v1 }
 0x3ad   : > { %1179 = vadd.xlane.f32.xlu1 %v1178_v55 }
 0x3ae   : > { %2051 = vmatmul.mubr.msk.bf16.vlgmr.msra.gmra.mrb[20].mxu0 %vm960_vm2, %v1184_v25 }
 0x3af   : > { %2066 = vmatprep.mubr.msk.bf16.mxu0 %vm2240_vm0, %v2239_v1 }
 0x3fd   : > { %v1171_v34 = vpop.xlane.xlu0 %1170 }
 0x3fe   : > { %2163 = vrcp.f32 %v1171_v34 }
 0x405   : > { %v1174_v36 = vpop.xlane.xlu1 %1173 }
 0x408   : > { %v2164_v38 = vpop.eup %2163 }
 0x432   : > { %v1177_v35 = vpop.xlane.xlu0 %1176 }
 0x433   : > { %2165 = vrcp.f32 %v1177_v35 }
 0x434   : > { %2167 = vrcp.f32 %v1174_v36 }
 0x43a   : > { %v1180_v37 = vpop.xlane.xlu1 %1179 }
 0x43b   : > { %2169 = vrcp.f32 %v1180_v37  ;;  %v1939_v37 = vld [vmem:[%s2668_s4] ss:$0 sm:$0xff] }
 0x43d   : > { %v2166_v39 = vpop.eup %2165 }
 0x43e   : > { %v2168_v48 = vpop.eup %2167 }
 0x445   : > { %v2170_v49 = vpop.eup %2169 }
 0x457   : > { %v1226_v6 = vpop.f32.mrb[4].mxu1  ;;  %v1272_v26 = vpop.f32.mrb[16].mxu0 }
 0x458   : > { %v2034_v27 = vpop.f32.mrb[5].mxu1  ;;  %v2040_v28 = vpop.f32.mrb[17].mxu0  ;;  %v1374_v41 = vmul.f32 %v2164_v38, %v1226_v6  ;;  %v1375_v51 = vmul.f32 %v2168_v48, %v1272_v26 }
 0x459   : > { %v1229_v29 = vpop.f32.mrb[6].mxu1  ;;  %v1275_v30 = vpop.f32.mrb[18].mxu0 }
 0x45a   : > { %v2035_v31 = vpop.f32.mrb[7].mxu1  ;;  %v2041_v32 = vpop.f32.mrb[19].mxu0 }
 0x479   : > { %v1318_v40 = vpop.f32.mrb[8].mxu1 }
 0x47a   : > { %v1376_v42 = vmul.f32 %v2166_v39, %v1318_v40  ;;  %v2046_v43 = vpop.f32.mrb[9].mxu1 }
 0x47b   : > { %v1321_v44 = vpop.f32.mrb[10].mxu1 }
 0x47c   : > { %v1378_v45 = vcombine.low %v1374_v41, %v1376_v42  ;;  %v1379_v46 = vcombine.high %v1374_v41, %v1376_v42  ;;  %v2047_v47 = vpop.f32.mrb[11].mxu1 }
 0x47e   : > { %v1386_v59 = vrot.slane %v1378_v45, %v2409_v23  ;;  %v1393_v60 = vrot.slane %v1379_v46, %v2409_v23 }
 0x481   : > { %v1364_v50 = vpop.f32.mrb[20].mxu0 }
 0x482   : > { %v1377_v52 = vmul.f32 %v2170_v49, %v1364_v50  ;;  %v2052_v53 = vpop.f32.mrb[21].mxu0  ;;  %v2145_v50 = vld [vmem:[%s2671_s7] sm:$0xff]  }
 0x483   : > { %v1367_v54 = vpop.f32.mrb[22].mxu0  ;;  %2063 = vmatpush3.bf16.msra.mxu0 %v2145_v50  ;;  %v2149_v53 = vld [vmem:[%s2673_s9 + $0x10] sm:$0xff]  }
 0x484   : > { %v1394_v56 = vcombine.low %v1375_v51, %v1377_v52  ;;  %v1395_v57 = vcombine.high %v1375_v51, %v1377_v52  ;;  %v2053_v58 = vpop.f32.mrb[23].mxu0  ;;  %v2146_v51 = vld [vmem:[%s2671_s7 + $0x8] sm:$0xff]   ;;  %2064 = vmatprep.subr.bf16.mxu0 %v2239_v1  ;;  %v2150_v54 = vld [vmem:[%s2673_s9 + $0x18] sm:$0xff]  }
 0x485   : > { %v2148_v52 = vld [vmem:[%s2673_s9 + $0x8] sm:$0xff]  }
 0x486   : > { %v1402_v61 = vrot.slane %v1394_v56, %v2409_v23  ;;  %v1409_v62 = vrot.slane %v1395_v57, %v2409_v23  ;;  %v2151_v56 = vld [vmem:[%s2673_s9 + $0x20] sm:$0xff]   ;;  %v2152_v57 = vld [vmem:[%s2673_s9 + $0x28] sm:$0xff]  }
 0x487   : > { %2065 = vmatpush3.bf16.msra.mxu0 %v2146_v51 }
 0x488   : > { %v1410_v63 = vcombine.low %v1386_v59, %v1402_v61  ;;  %v1411_v0 = vcombine.high %v1386_v59, %v1402_v61  ;;  %v1426_v2 = vcombine.low %v1393_v60, %v1409_v62  ;;  %v1427_v4 = vcombine.high %v1393_v60, %v1409_v62  ;;  %v1943_v62 = vld [vmem:[%s2669_s5] ss:$0 sm:$0xff] }
 0x48a   : > { %v1418_v7 = vrot.slane %v1410_v63, %v2417_v33  ;;  %v1425_v8 = vrot.slane %v1411_v0, %v2417_v33  ;;  %v1434_v9 = vrot.slane %v1426_v2, %v2417_v33  ;;  %v1441_v10 = vrot.slane %v1427_v4, %v2417_v33  ;;  %v1944_v0 = vld [vmem:[%s2670_s6] ss:$0 sm:$0xff] }
 0x48c   : > { %v1446_v11 = vcombine.low %v1418_v7, %v1425_v8  ;;  %v1937_v14 = vcombine.high %v1418_v7, %v1425_v8  ;;  %v1462_v15 = vcombine.low %v1434_v9, %v1441_v10  ;;  %v1938_v16 = vcombine.high %v1434_v9, %v1441_v10  ;;  %v2153_v7 = vld [vmem:[%s2673_s9 + $0x30] sm:$0xff]   ;;  %v2154_v8 = vld [vmem:[%s2673_s9 + $0x38] sm:$0xff]   ;;  %v1945_v9 = vld [vmem:[%s2672_s8] ss:$0 sm:$0xff] }
 0x48e   : > { %v1453_v18 = vrot.slane %v1446_v11, %v2409_v23  ;;  %v1461_v19 = vrot.slane %v1937_v14, %v2409_v23  ;;  %v1469_v13 = vrot.slane %v1462_v15, %v2409_v23  ;;  %v1477_v20 = vrot.slane %v1938_v16, %v2409_v23 }
 0x490   : > { %v1479_v21 = vcombine.high %v1453_v18, %v1461_v19  ;;  %v1495_v22 = vcombine.high %v1469_v13, %v1477_v20  ;;  %v1478_v12 = vcombine.low %v1453_v18, %v1461_v19  ;;  %v1494_v24 = vcombine.low %v1469_v13, %v1477_v20 }
 0x492   : > { %v1493_v55 = vrot.slane %v1479_v21, %v2417_v33  ;;  %v1509_v25 = vrot.slane %v1495_v22, %v2417_v33  ;;  %v1486_v6 = vrot.slane %v1478_v12, %v2417_v33  ;;  %v1502_v26 = vrot.slane %v1494_v24, %v2417_v33 }
 0x494   : > { %v1512_v27 = vcombine.low %v1493_v55, %v1509_v25  ;;  %v1511_v28 = vcombine.high %v1486_v6, %v1502_v26  ;;  %v1513_v29 = vcombine.high %v1493_v55, %v1509_v25  ;;  %v1510_v30 = vcombine.low %v1486_v6, %v1502_v26 }
 0x496   : > { %1519 = vrot.lane.b32.xlu1 %v1512_v27, %s2248_s24  ;;  %1515 = vrot.lane.b32.xlu0 %v1511_v28, %s2249_s30  ;;  %s429_s30 = sand.u32 1, %s2229_s26  }
 0x497   : > { %s1841_s16 = scalar_lea.sflag [#allocation3], %s429_s30 }
 0x49a   : > { %1523 = vrot.lane.b32.xlu1 %v1513_v29, %s2250_s15  ;;  %s1917_s15 = sshll.u32 %s429_s30, 3 }
 0x49b   : > { %s431_s24 = scalar_lea.vmem [#allocation2], %s1917_s15  ;;  %s2179_s15 = sshll.u32 %s2251_s29, 4  ;;  %s2180_s15 = int_to_ptr.vmem [resolvable:$false] %s2179_s15 }
 0x49c   : > { %s1854_s0 = sshll.u32 %s431_s24, 4  ;;  %s2181_s21 = scalar_lea.vmem %s2180_s15, 256  ;;  %s2623_s0 = int_to_ptr.vmem [resolvable:$true] %s1854_s0 }
 0x49d   : > { %s2175_s20 = scalar_lea.vmem %s2623_s0, 128  ;;  %p2182_p0 = scmp.lt.s32.totalorder %s2623_s0, %s2180_s15 }
 0x49e   : > { %p2176_p11 = scmp.ne.s32.totalorder %s2623_s0, %s2175_s20  ;;  %p2183_p1 = scmp.lt.s32.totalorder %s2181_s21, %s2175_s20 }
 0x4a0   : > { %p2177_p12 = pnand %p2176_p11, %p2360_p5  ;;  %p2184_p2 = por %p2183_p1, %p2182_p0 }
 0x4a2   : > { %p2178_p13 = pneg %p2177_p12 }
 0x4a4   : > { %p2185_p3 = pnand %p2184_p2, %p2178_p13 }
 0x508   : > { %v1520_v23 = vpop.permute.xlu1 %1519  ;;  %v1516_v31 = vpop.permute.xlu0 %1515 }
 0x509   : > { %v1526_v32 = vsel %vm960_vm2, %v1510_v30, %v1516_v31  ;;  %v1958_v31 = vld [vmem:[%s2675_s11] ss:$0 sm:$0xff] }
 0x50a   : > { %v1528_v35 = vsel %vm1527_vm4, %v1526_v32, %v1520_v23 }
 0x50c   : > { %v1524_v34 = vpop.permute.xlu1 %1523 }
 0x50d   : > { %v1530_v36 = vsel %vm1529_vm5, %v1528_v35, %v1524_v34  ;;  %v1959_v34 = vld [vmem:[%s2676_s12] ss:$0 sm:$0xff] }
 0x50e   : > { %v1535_v33 = vpack.c.bf16 %v1530_v36, %v1530_v36 }
 0x510   : > { %2059 = vmatmul.mubr.msk.bf16.vlgmr.msra.gmra.mrb[12].mxu1 %vm462_vm1, %v1535_v33 }
 0x511   : > { %2086 = vmatprep.mubr.msk.bf16.mxu1 %vm2240_vm0, %v2239_v1 }
 0x5e3   : > { %v1592_v38 = vpop.f32.mrb[12].mxu1 }
 0x5e4   : > { %v1593_v39 = vadd.f32 %v1939_v37, %v1592_v38  ;;  %v2060_v40 = vpop.f32.mrb[13].mxu1 }
 0x5e5   : > { %v1595_v41 = vpop.f32.mrb[14].mxu1 }
 0x5e6   : > { %v2061_v42 = vpop.f32.mrb[15].mxu1  ;;  %v1598_v43 = vadd.f32 %v1593_v39, %v2389_v3  ;;  %v2147_v3 = vld [vmem:[%s2673_s9] sm:$0xff]  }
 0x5e7   : > { %2071 = vmatpush3.bf16.msra.mxu1 %v2147_v3 }
 0x5e8   : > { %v1601_v44 = vsel %vm462_vm1, %v1598_v43, 0.0  ;;  %2072 = vmatprep.subr.bf16.mxu1 %v2239_v1 }
 0x5e9   : > { %1602 = vadd.xlane.f32.xlu0 %v1601_v44 }
 0x5eb   : > { %2073 = vmatpush3.bf16.msra.mxu1 %v2148_v52 }
 0x5ec   : > { %2074 = vmatprep.subr.bf16.mxu1 %v2239_v1 }
 0x5ef   : > { %2075 = vmatpush3.bf16.msra.mxu1 %v2149_v53 }
 0x5f0   : > { %2076 = vmatprep.subr.bf16.mxu1 %v2239_v1 }
 0x5f3   : > { %2077 = vmatpush3.bf16.msra.mxu1 %v2150_v54 }
 0x5f4   : > { %2078 = vmatprep.subr.bf16.mxu1 %v2239_v1 }
 0x5f7   : > { %2079 = vmatpush3.bf16.msra.mxu1 %v2151_v56 }
 0x5f8   : > { %2080 = vmatprep.subr.bf16.mxu1 %v2239_v1 }
 0x5fb   : > { %2081 = vmatpush3.bf16.msra.mxu1 %v2152_v57 }
 0x5fc   : > { %2082 = vmatprep.subr.bf16.mxu1 %v2239_v1 }
 0x5ff   : > { %2083 = vmatpush3.bf16.msra.mxu1 %v2153_v7 }
 0x600   : > { %2084 = vmatprep.subr.bf16.mxu1 %v2239_v1  ;;  %v1949_v1 = vld [vmem:[%s2674_s10] ss:$0 sm:$0xff] }
 0x603   : > { %2085 = vmatpush3.bf16.msra.mxu1 %v2154_v8 }
 0x676   : > { %v1603_v45 = vpop.xlane.xlu0 %1602 }
 0x677   : > { %v1605_v46 = vmul.f32 0.03125, %v1603_v45 }
 0x679   : > { %v1606_v47 = vsub.f32 %v1598_v43, %v1605_v46 }
 0x67b   : > { %v1607_v48 = vmul.f32 %v1606_v47, %v1606_v47 }
 0x67d   : > { %v1608_v49 = vsel %vm462_vm1, %v1607_v48, 0.0 }
 0x67e   : > { %1609 = vadd.xlane.f32.xlu1 %v1608_v49 }
 0x70b   : > { %v1610_v58 = vpop.xlane.xlu1 %1609 }
 0x70c   : > { %v1611_v59 = vmul.f32 0.03125, %v1610_v58 }
 0x70e   : > { %v1612_v60 = vadd.f32 1e-05, %v1611_v59 }
 0x710   : > { %2171 = vrsqrt.f32 %v1612_v60 }
 0x71a   : > { %v2172_v61 = vpop.eup %2171 }
 0x71b   : > { %v1614_v63 = vmul.f32 %v2172_v61, %v1606_v47 }
 0x71d   : > { %v1621_v2 = vmul.f32 %v1943_v62, %v1614_v63 }
 0x71f   : > { %v1628_v4 = vadd.f32 %v1944_v0, %v1621_v2 }
 0x721   : > { %v1633_v5 = vpack.c.bf16 %v1628_v4, %v1628_v4 }
 0x723   : > { %2067 = vmatmul.mubr.msk.bf16.vlgmr.msra.gmra.mrb[24].mxu0 %vm462_vm1, %v1633_v5 }
 0x7f6   : > { %v1690_v10 = vpop.f32.mrb[24].mxu0 }
 0x7f7   : > { %v1691_v11 = vadd.f32 %v1945_v9, %v1690_v10  ;;  %v2068_v14 = vpop.f32.mrb[25].mxu0 }
 0x7f8   : > { %v1693_v15 = vpop.f32.mrb[26].mxu0 }
 0x7f9   : > { %v1696_v16 = vmax.f32 %v1691_v11, 0.0  ;;  %v2069_v17 = vpop.f32.mrb[27].mxu0 }
 0x7fb   : > { %v1713_v18 = vpack.c.bf16 %v1696_v16, %v1696_v16 }
 0x7fd   : > { %2087 = vmatmul.mubr.bf16.vlgmr.msra.gmra.mrb[16].mxu1 %v1713_v18 }
 0x8d0   : > { %v1803_v19 = vpop.f32.mrb[16].mxu1 }
 0x8d1   : > { %v1804_v13 = vadd.f32 %v1949_v1, %v1803_v19  ;;  %v2088_v20 = vpop.f32.mrb[17].mxu1 }
 0x8d2   : > { %v1806_v21 = vpop.f32.mrb[18].mxu1 }
 0x8d3   : > { %v2089_v22 = vpop.f32.mrb[19].mxu1  ;;  %v1809_v12 = vadd.f32 %v1804_v13, %v1628_v4 }
 0x8d5   : > { %v1812_v24 = vsel %vm462_vm1, %v1809_v12, 0.0 }
 0x8d6   : > { %1813 = vadd.xlane.f32.xlu0 %v1812_v24 }
 0x963   : > { %v1814_v55 = vpop.xlane.xlu0 %1813 }
 0x964   : > { %v1815_v25 = vmul.f32 0.03125, %v1814_v55 }
 0x966   : > { %v1816_v6 = vsub.f32 %v1809_v12, %v1815_v25 }
 0x968   : > { %v1817_v26 = vmul.f32 %v1816_v6, %v1816_v6 }
 0x96a   : > { %v1818_v27 = vsel %vm462_vm1, %v1817_v26, 0.0 }
 0x96b   : > { %1819 = vadd.xlane.f32.xlu0 %v1818_v27 }
 0x9f8   : > { %v1820_v28 = vpop.xlane.xlu0 %1819 }
 0x9f9   : > { %v1821_v29 = vmul.f32 0.03125, %v1820_v28 }
 0x9fb   : > { %v1822_v30 = vadd.f32 1e-05, %v1821_v29 }
 0x9fd   : > { %2173 = vrsqrt.f32 %v1822_v30 }
 0xa07   : > { %v2174_v23 = vpop.eup %2173 }
 0xa08   : > { %v1824_v32 = vmul.f32 %v2174_v23, %v1816_v6 }
 0xa0a   : > { %v1831_v35 = vmul.f32 %v1958_v31, %v1824_v32 }
 0xa0c   : > { %v1838_v36 = vadd.f32 %v1959_v34, %v1831_v35 }
 0xa0e   : > { %1839 = vst.msk [vmem:[%s431_s24] sm:$0xff] %vm462_vm1, %v1838_v36 }
 0xa0f   : > { %2188 = shalt.err (!%p2185_p3)
}
 0xa10   : > { %s2189_s1 = scalar_lea.hbm %s2621_s3, 128  ;;  %s2193_s22 = scalar_lea.hbm %s2677_s13, 256 }
 0xa11   : > { %p2190_p4 = scmp.ne.s32.totalorder %s2621_s3, %s2189_s1  ;;  %p2194_p9 = scmp.lt.u32.totalorder %s2621_s3, %s2677_s13 }
 0xa12   : > { %p2195_p10 = scmp.lt.u32.totalorder %s2193_s22, %s2189_s1  ;;  %p2197_p12 = scmp.lt.u32.totalorder %s2189_s1, %s2621_s3 }
 0xa13   : > { %p2191_p7 = pnand %p2190_p4, %p2360_p5 }
 0xa14   : > { %p2196_p11 = por %p2195_p10, %p2194_p9 }
 0xa15   : > { %p2192_p8 = pneg %p2191_p7 }
 0xa16   : > { %p2198_p13 = por %p2197_p12, %p2196_p11 }
 0xa18   : > { %p2199_p0 = pnand %p2198_p13, %p2192_p8 }
 0xa1a   : > { %2202 = shalt.err (!%p2199_p0)
}
 0xa1b   : > { %2090 = dma.vmem_to_hbm [thread:$0]  (%p2360_p5), %s2623_s0, 128, %s2621_s3, %s1841_s16  }
 0xa1c PF: > { %p2096_p1 = scmp.ge.s32.totalorder %s2237_s28, 2  ;;  %s1866_s20 = sand.u32 1, %s2225_s25  }
 0xa1d   : > { %s1867_s29 = scalar_lea.sflag [#allocation3], %s1866_s20 }
 0xa1e   : > { %p2093_p2 = pnand %p2096_p1, %p2364_p6 }
 0xa20   : > { %2220 = dma.done.wait (!%p2093_p2), %s1867_s29, 128  }
 0xa21   : > { %2222 = vsyncadd (!%p2093_p2), %s1867_s29, 4294967168  ;;  %p23_p3 = scmp.ge.s32.totalorder %s2347_s14, 4   ;;  %s2688_s25 = smov %s2229_s26 }
 0xa22   : > { %s2689_s26 = smov %s2233_s27  ;;  %s2690_s27 = smov %s2358_s17 }
 0xa23   : > { %s2691_s28 = smov %s2347_s14  ;;  %25 = sbr.rel (!%p23_p3) target bundleno = 8 (0x8), region = 107 }
 0xa2a   :  { %1872 = vsyncpa [#allocation3], 1 }
 0xa2b   :  { %1874 = vsyncpa [#allocation3 + $0x1], 1 }

</bundles_post_ra>
